<compile_context>
chip_gen: v7x
topology: tpu7x:2x2x1
jax: 0.10.0
libtpu: 0.0.40
codegen_flags: <defaults>
</compile_context>

<pallas_src>
import jax
import jax.numpy as jnp
from jax.experimental import pallas as pl
from jax.experimental.pallas import tpu as pltpu


def control_unit_kernel(question_ref, control_ref, context_ref,
                        wq_ref, wc_ref, bias_ref, out_ref):
    q    = question_ref[...]                     # [TB, 2d]
    ctrl = control_ref[...]                      # [TB, d]
    ctx  = context_ref[...]                      # [TB, S, d]

    # control_question with position_aware AND attn weight folded in
    # (wrapper-side weight folds): cq[b,d] already carries attn_w[d].
    cq = (jnp.dot(q, wq_ref[...], preferred_element_type=jnp.float32)
          + jnp.dot(ctrl, wc_ref[...], preferred_element_type=jnp.float32)
          + bias_ref[...])                       # [TB, d] f32

    # logit[b,s] = <ctx[b,s,:], cq[b,:]>  -- VPU multiply + lane reduce.
    logit = jnp.sum(ctx * cq[:, None, :], axis=-1)        # [TB, S]

    # softmax over the sequence axis (torch dim=1); attn bias dropped
    # (softmax is shift-invariant -> identical output).
    m = jnp.max(logit, axis=-1, keepdims=True)             # [TB, 1]
    e = jnp.exp(logit - m)                                  # [TB, S]
    denom = jnp.sum(e, axis=-1, keepdims=True)              # [TB, 1]

    # next_control = sum_s softmax(logit)[b,s] * ctx[b,s,:]
    num = jnp.sum(e[:, :, None] * ctx, axis=1)              # [TB, d]
    inv = pl.reciprocal(denom, approx=True)                 # EUP, off the VALU
    out_ref[...] = (num * inv).astype(out_ref.dtype)


def _pick_block_b(B, S, dim, itemsize, *, tile_budget_bytes=8 << 20):
    """Batch tile: ~8 MiB of context per tile, multiple of 8 when tiling
    (ragged last block is handled by the pl.cdiv grid), and at least 2 grid
    steps when B allows so v7x megacore can shard the batch axis."""
    per_row = max(1, S * dim * itemsize)
    cap = max(8, (tile_budget_bytes // per_row) // 8 * 8)
    tb = min(B, cap)
    if tb < B:
        tb = max(8, (tb // 8) * 8)
    if B >= 16:  # guarantee >=2 grid steps for megacore sharding (v7x)
        tb = min(tb, max(8, (B // 16) * 8))
    return tb


def control_unit_forward(params, step, context, question, control):
    B, S, dim = context.shape

    # --- wrapper-side folds (once per step) ---
    # position_aware[step] folded into the question path, attn weight folded
    # into all of wq / wc / bias (column scaling). attn bias is dropped
    # because the softmax that follows is shift-invariant.
    pa_w = params["pa_w"][step]                 # [2d, d]
    pa_b = params["pa_b"][step]                 # [1, d]
    wc_half = params["cq_w"][:dim]              # [d, d]  control half of concat
    wp_half = params["cq_w"][dim:]              # [d, d]  position-aware half
    attn_w = params["attn_w"]                   # [1, d]

    wq = (pa_w @ wp_half) * attn_w              # [2d, d]
    wc = wc_half * attn_w                       # [d, d]
    bias = (pa_b @ wp_half + params["cq_b"]) * attn_w   # [1, d]

    tb = _pick_block_b(B, S, dim, context.dtype.itemsize)
    grid = (pl.cdiv(B, tb),)

    in_specs = [
        pl.BlockSpec((tb, 2 * dim), lambda i: (i, 0)),          # question (tiled on B)
        pl.BlockSpec((tb, dim),     lambda i: (i, 0)),          # control  (tiled on B)
        pl.BlockSpec((tb, S, dim),  lambda i: (i, 0, 0)),       # context  (tiled on B)
        pl.BlockSpec((2 * dim, dim), lambda i: (0, 0)),         # wq   (VMEM resident)
        pl.BlockSpec((dim, dim),     lambda i: (0, 0)),         # wc   (VMEM resident)
        pl.BlockSpec((1, dim),       lambda i: (0, 0)),         # bias (VMEM resident)
    ]
    out_spec = pl.BlockSpec((tb, dim), lambda i: (i, 0))

    return pl.pallas_call(
        control_unit_kernel,
        out_shape=jax.ShapeDtypeStruct((B, dim), jnp.float32),
        grid=grid,
        in_specs=in_specs,
        out_specs=out_spec,
        compiler_params=pltpu.CompilerParams(
            dimension_semantics=("parallel",),
            vmem_limit_bytes=48 * 1024 * 1024,   # safe on v7x (64 MiB), ample on v5e/v6e
        ),
    )(question, control, context, wq, wc, bias)


def xavier_uniform(key, in_dim, out_dim):
    # matches torch.nn.init.xavier_uniform_ bounds (gain=1)
    bound = (6.0 / (in_dim + out_dim)) ** 0.5
    return jax.random.uniform(key, (in_dim, out_dim), jnp.float32, -bound, bound)


def init_control_unit_params(key, dim, max_step):
    keys = jax.random.split(key, max_step + 2)
    return {
        # position-aware linears: max_step x (2d -> d), zero bias
        "pa_w": jnp.stack([xavier_uniform(keys[i], 2 * dim, dim)
                           for i in range(max_step)]),            # [max_step, 2d, d]
        "pa_b": jnp.zeros((max_step, 1, dim), jnp.float32),
        # control_question: 2d -> d
        "cq_w": xavier_uniform(keys[max_step], 2 * dim, dim),     # [2d, d]
        "cq_b": jnp.zeros((1, dim), jnp.float32),
        # attn: d -> 1 (stored row-major as [1, d])
        "attn_w": xavier_uniform(keys[max_step + 1], dim, 1).T,   # [1, d]
        "attn_b": jnp.zeros((1, 1), jnp.float32),
    }


def control_unit_reference(params, step, context, question, control):
    """Pure-JAX reference reproducing the PyTorch forward exactly."""
    pa = question @ params["pa_w"][step] + params["pa_b"][step]
    cq_in = jnp.concatenate([control, pa], axis=1)
    cq = cq_in @ params["cq_w"] + params["cq_b"]
    prod = cq[:, None, :] * context
    logit = prod @ params["attn_w"].T + params["attn_b"][0, 0]     # [B, S, 1]
    attn = jax.nn.softmax(logit, axis=1)
    return jnp.sum(attn * context, axis=1)


if __name__ == "__main__":
    dim, max_step = 32, 4
    B, S = 2, 8
    step = 1

    key = jax.random.PRNGKey(0)
    kp, kc, kq, kctl = jax.random.split(key, 4)
    params = init_control_unit_params(kp, dim, max_step)

    context = jax.random.normal(kc, (B, S, dim), jnp.float32)
    question = jax.random.normal(kq, (B, 2 * dim), jnp.float32)
    control = jax.random.normal(kctl, (B, dim), jnp.float32)

    out = control_unit_forward(params, step, context, question, control)
    out = jax.block_until_ready(out)

    ref = control_unit_reference(params, step, context, question, control)
    assert out.shape == (B, dim)
    # 1e-3 tolerance: approx EUP reciprocal (~2^-12 rel) + wrapper weight-fold
    # associativity vs the PyTorch (q@pa_w)@wp ordering.
    assert jnp.allclose(out, ref, atol=1e-3, rtol=1e-3), "mismatch vs reference"

    print("KERNEL_OK")
</pallas_src>

<mosaic_0001>
module attributes {stable_mosaic.version = 11 : i64} {
  func.func @control_unit_kernel(%arg0: i32, %arg1: memref<2x64xf32, #tpu.memory_space<vmem>>, %arg2: memref<2x32xf32, #tpu.memory_space<vmem>>, %arg3: memref<2x8x32xf32, #tpu.memory_space<vmem>>, %arg4: memref<64x32xf32, #tpu.memory_space<vmem>>, %arg5: memref<32x32xf32, #tpu.memory_space<vmem>>, %arg6: memref<1x32xf32, #tpu.memory_space<vmem>>, %arg7: memref<2x32xf32, #tpu.memory_space<vmem>>) attributes {dimension_semantics = [#tpu.dimension_semantics<parallel>], iteration_bounds = array<i64: 1>, scalar_prefetch = 0 : i64, scratch_operands = 0 : i64, tpu.core_type = #tpu.core_type<tc>, window_params = [{transform_indices = @transform_0, window_bounds = array<i64: 2, 64>}, {transform_indices = @transform_1, window_bounds = array<i64: 2, 32>}, {transform_indices = @transform_2, window_bounds = array<i64: 2, 8, 32>}, {pipeline_mode = #tpu.pipeline_mode<synchronous>, transform_indices = @transform_3, window_bounds = array<i64: 64, 32>}, {pipeline_mode = #tpu.pipeline_mode<synchronous>, transform_indices = @transform_4, window_bounds = array<i64: 32, 32>}, {pipeline_mode = #tpu.pipeline_mode<synchronous>, transform_indices = @transform_5, window_bounds = array<i64: 1, 32>}, {transform_indices = @transform_6, window_bounds = array<i64: 2, 32>}]} {
    %c0 = arith.constant 0 : index
    %c0_0 = arith.constant 0 : index
    %0 = vector.load %arg1[%c0, %c0_0] : memref<2x64xf32, #tpu.memory_space<vmem>>, vector<2x64xf32>
    %c0_1 = arith.constant 0 : index
    %c0_2 = arith.constant 0 : index
    %1 = vector.load %arg2[%c0_1, %c0_2] : memref<2x32xf32, #tpu.memory_space<vmem>>, vector<2x32xf32>
    %c0_3 = arith.constant 0 : index
    %c0_4 = arith.constant 0 : index
    %c0_5 = arith.constant 0 : index
    %2 = vector.load %arg3[%c0_3, %c0_4, %c0_5] : memref<2x8x32xf32, #tpu.memory_space<vmem>>, vector<2x8x32xf32>
    %c0_6 = arith.constant 0 : index
    %c0_7 = arith.constant 0 : index
    %3 = vector.load %arg4[%c0_6, %c0_7] : memref<64x32xf32, #tpu.memory_space<vmem>>, vector<64x32xf32>
    %cst = arith.constant dense<0.000000e+00> : vector<2x32xf32>
    %4 = tpu.matmul %0, %3, %cst {dimension_numbers = #tpu.dot_dimension_numbers<[1], [0], [0], [1], [0, 0, 1, 1], [], []>} : vector<2x64xf32>, vector<64x32xf32>, vector<2x32xf32> -> vector<2x32xf32>
    %c0_8 = arith.constant 0 : index
    %c0_9 = arith.constant 0 : index
    %5 = vector.load %arg5[%c0_8, %c0_9] : memref<32x32xf32, #tpu.memory_space<vmem>>, vector<32x32xf32>
    %cst_10 = arith.constant dense<0.000000e+00> : vector<2x32xf32>
    %6 = tpu.matmul %1, %5, %cst_10 {dimension_numbers = #tpu.dot_dimension_numbers<[1], [0], [0], [1], [0, 0, 1, 1], [], []>} : vector<2x32xf32>, vector<32x32xf32>, vector<2x32xf32> -> vector<2x32xf32>
    %7 = arith.addf %4, %6 : vector<2x32xf32>
    %c0_11 = arith.constant 0 : index
    %c0_12 = arith.constant 0 : index
    %8 = vector.load %arg6[%c0_11, %c0_12] : memref<1x32xf32, #tpu.memory_space<vmem>>, vector<1x32xf32>
    %9 = vector.broadcast %8 : vector<1x32xf32> to vector<2x32xf32>
    %10 = arith.addf %7, %9 : vector<2x32xf32>
    %11 = vector.shape_cast %10 : vector<2x32xf32> to vector<2x1x32xf32>
    %12 = vector.broadcast %11 : vector<2x1x32xf32> to vector<2x8x32xf32>
    %13 = arith.mulf %2, %12 : vector<2x8x32xf32>
    %cst_13 = arith.constant dense<0.000000e+00> : vector<2x8xf32>
    %14 = vector.multi_reduction <add>, %13, %cst_13 [2] : vector<2x8x32xf32> to vector<2x8xf32>
    %cst_14 = arith.constant dense<0xFF800000> : vector<2xf32>
    %15 = vector.multi_reduction <maximumf>, %14, %cst_14 [1] : vector<2x8xf32> to vector<2xf32>
    %16 = vector.shape_cast %15 : vector<2xf32> to vector<2x1xf32>
    %17 = vector.broadcast %16 : vector<2x1xf32> to vector<2x8xf32>
    %18 = arith.subf %14, %17 : vector<2x8xf32>
    %19 = math.exp %18 : vector<2x8xf32>
    %cst_15 = arith.constant dense<0.000000e+00> : vector<2xf32>
    %20 = vector.multi_reduction <add>, %19, %cst_15 [1] : vector<2x8xf32> to vector<2xf32>
    %21 = vector.shape_cast %20 : vector<2xf32> to vector<2x1xf32>
    %22 = vector.shape_cast %19 : vector<2x8xf32> to vector<2x8x1xf32>
    %23 = vector.broadcast %22 : vector<2x8x1xf32> to vector<2x8x32xf32>
    %24 = arith.mulf %23, %2 : vector<2x8x32xf32>
    %cst_16 = arith.constant dense<0.000000e+00> : vector<2x32xf32>
    %25 = vector.multi_reduction <add>, %24, %cst_16 [1] : vector<2x8x32xf32> to vector<2x32xf32>
    %26 = tpu.reciprocal %21 {approx = true} : vector<2x1xf32> -> vector<2x1xf32>
    %27 = vector.broadcast %26 : vector<2x1xf32> to vector<2x32xf32>
    %28 = arith.mulf %25, %27 : vector<2x32xf32>
    %c0_17 = arith.constant 0 : index
    %c0_18 = arith.constant 0 : index
    %29 = vector.load %arg7[%c0_17, %c0_18] : memref<2x32xf32, #tpu.memory_space<vmem>>, vector<2x32xf32>
    tpu.vector_store %arg7[%c0_17, %c0_18], %28 {strides = array<i32>} : memref<2x32xf32, #tpu.memory_space<vmem>>, vector<2x32xf32>,
    return
  }
  func.func @transform_0(%arg0: i32) -> (i32, i32) {
    %c0_i32 = arith.constant 0 : i32
    %c0_i32_0 = arith.constant 0 : i32
    return %arg0, %c0_i32 : i32, i32
  }
  func.func @transform_1(%arg0: i32) -> (i32, i32) {
    %c0_i32 = arith.constant 0 : i32
    %c0_i32_0 = arith.constant 0 : i32
    return %arg0, %c0_i32 : i32, i32
  }
  func.func @transform_2(%arg0: i32) -> (i32, i32, i32) {
    %c0_i32 = arith.constant 0 : i32
    %c0_i32_0 = arith.constant 0 : i32
    %c0_i32_1 = arith.constant 0 : i32
    return %arg0, %c0_i32, %c0_i32_0 : i32, i32, i32
  }
  func.func @transform_3(%arg0: i32) -> (i32, i32) {
    %c0_i32 = arith.constant 0 : i32
    %c0_i32_0 = arith.constant 0 : i32
    %c0_i32_1 = arith.constant 0 : i32
    return %c0_i32, %c0_i32_0 : i32, i32
  }
  func.func @transform_4(%arg0: i32) -> (i32, i32) {
    %c0_i32 = arith.constant 0 : i32
    %c0_i32_0 = arith.constant 0 : i32
    %c0_i32_1 = arith.constant 0 : i32
    return %c0_i32, %c0_i32_0 : i32, i32
  }
  func.func @transform_5(%arg0: i32) -> (i32, i32) {
    %c0_i32 = arith.constant 0 : i32
    %c0_i32_0 = arith.constant 0 : i32
    %c0_i32_1 = arith.constant 0 : i32
    return %c0_i32, %c0_i32_0 : i32, i32
  }
  func.func @transform_6(%arg0: i32) -> (i32, i32) {
    %c0_i32 = arith.constant 0 : i32
    %c0_i32_0 = arith.constant 0 : i32
    return %arg0, %c0_i32 : i32, i32
  }
}

</mosaic_0001>

<bundles_post_ra>
// kernel: tpu_custom_call.1
= control target key start
LH: loop header
LB: loop body
LE: loop exit
PB: predicated region body
PF: predicated region fallthrough
CT: control target
= control target key end

     0   :  { %v443_v3 = vmov 0.0|0.0   ;;  %vm444_vm0 = vmmov 0   ;;  %v445_v10 = vmov 0.0   ;;  %s557_s0 = inlined_call_operand.vmem [shape: f32[2,64], index: 0, kind: input, shape index: {}]   ;;  %s558_s1 = inlined_call_operand.vmem [shape: f32[2,32], index: 1, kind: input, shape index: {}]   ;;  %s559_s2 = inlined_call_operand.vmem [shape: f32[2,8,32], index: 2, kind: input, shape index: {}]   ;;  %s560_s3 = inlined_call_operand.vmem [shape: f32[64,32], index: 3, kind: input, shape index: {}]   ;;  %s561_s4 = inlined_call_operand.vmem [shape: f32[32,32], index: 4, kind: input, shape index: {}]   ;;  %s562_s5 = inlined_call_operand.vmem [shape: f32[1,32], index: 5, kind: input, shape index: {}]   ;;  %s563_s6 = inlined_call_operand.hbm [shape: f32[2,32], index: 6, kind: output, shape index: {}]  }
   0x1   :  { %v28_v0 = vld [vmem:[%s560_s3] sm:$0xff]  ;;  %v29_v1 = vld [vmem:[%s560_s3 + $0x8] sm:$0xff]  ;;  %v30_v2 = vld [vmem:[%s560_s3 + $0x10] sm:$0xff]  ;;  %393 = vmatprep.subr.bf16.mxu1 %v443_v3  ;;  %387 = vmatprep.subr.bf16.mxu0 %v443_v3 }
   0x2   :  { %v394_v4 = vpack.c.bf16 %v29_v1, %v28_v0  ;;  %v31_v5 = vld [vmem:[%s560_s3 + $0x18] sm:$0xff]  ;;  %v36_v6 = vld [vmem:[%s561_s4] sm:$0xff]  ;;  %v37_v7 = vld [vmem:[%s561_s4 + $0x8] sm:$0xff]  ;;  %365 = vmatprep.mubr.msk.f32.mxu0 %vm444_vm0, %v445_v10  ;;  %384 = vmatprep.mubr.msk.f32.mxu1 %vm444_vm0, %v445_v10 }
   0x3   :  { %v388_v8 = vpack.c.bf16 %v37_v7, %v36_v6  ;;  %v38_v9 = vld [vmem:[%s561_s4 + $0x10] sm:$0xff]  ;;  %v397_v11 = vpack.c.bf16 %v31_v5, %v30_v2  ;;  %v39_v12 = vld [vmem:[%s561_s4 + $0x18] sm:$0xff]  ;;  %v32_v13 = vld [vmem:[%s560_s3 + $0x20] sm:$0xff] }
   0x4   :  { %395 = vmatpush3.bf16.msra.mxu1 %v394_v4  ;;  %v33_v14 = vld [vmem:[%s560_s3 + $0x28] sm:$0xff]  ;;  %v391_v15 = vpack.c.bf16 %v39_v12, %v38_v9 }
   0x5   :  { %396 = vmatprep.subr.bf16.mxu1 %v443_v3  ;;  %389 = vmatpush3.bf16.msra.mxu0 %v388_v8 }
   0x6   :  { %11 = vsyncpa [#allocation3], 0  ;;  %390 = vmatprep.subr.bf16.mxu0 %v443_v3  ;;  %v400_v16 = vpack.c.bf16 %v33_v14, %v32_v13  ;;  %v34_v17 = vld [vmem:[%s560_s3 + $0x30] sm:$0xff]  ;;  %v35_v18 = vld [vmem:[%s560_s3 + $0x38] sm:$0xff]  ;;  %vm40_vm1 = vcmask 261120   ;;  %vm114_vm2 = vcmask 523264   ;;  %v200_v25 = vlaneseq }
   0x7   :  { %v25_v19 = vld [vmem:[%s558_s1] sm:$0x3]  ;;  %v403_v20 = vpack.c.bf16 %v35_v18, %v34_v17  ;;  %v446_v23 = vmov 1966171168   ;;  %v27_v42 = vld [vmem:[%s559_s2 + $0x8] sm:$0xff]  ;;  %vm249_vm3 = vcmask 1041409  }
   0x8   :  { %398 = vmatpush3.bf16.msra.mxu1 %v397_v11  ;;  %v24_v21 = vld [vmem:[%s557_s0] sm:$0x3]  ;;  %v198_v24 = vunpack.c.l.s4 %v446_v23  ;;  %v201_v28 = vshrl.u32 %v200_v25, 7  ;;  %v240_v48 = vand.u32 127, %v200_v25  ;;  %vm252_vm4 = vcmask 58368  }
   0x9   :  { %399 = vmatprep.subr.bf16.mxu1 %v443_v3  ;;  %392 = vmatpush3.bf16.msra.mxu0 %v391_v15  ;;  %v342_v30 = vld [vmem:[%s562_s5] ss:$0 sm:$0xff]  ;;  %v447_v56 = vmov 0   ;;  %vm324_vm5 = vcmask 254976  }
   0xa   :  { %v199_v27 = vunpack.c.0.s8 %v198_v24  ;;  %v221_v36 = vsub.s32 0, %v201_v28  ;;  %v26_v39 = vld [vmem:[%s559_s2] sm:$0xff]  ;;  %v243_v50 = vsub.s32 %v240_v48, %v201_v28  ;;  %412 = vset.pattern.permute.xlu0 %v447_v56  ;;  %411 = vset.pattern.permute.xlu1 %v447_v56  ;;  %v263_v57 = vsub.s32 1, %v201_v28  ;;  %s448_s2 = smov [#allocation2]  }
   0xb   :  { %s332_s5 = sshll.u32 %s448_s2, 4  ;;  %s333_s5 = int_to_ptr.vmem [resolvable:$true] %s332_s5 }
   0xc   :  { %401 = vmatpush3.bf16.msra.mxu1 %v400_v16  ;;  %366 = vmatmul.mubr.msk.f32.vlgmr.msra.gmra.mrb[0].mxu0 %vm40_vm1, %v25_v19  ;;  %v202_v32 = vsub.s32 %v199_v27, %v201_v28  ;;  %s419_s27 = scalar_lea.vmem %s333_s5, 32  ;;  %p424_p1 = scmp.lt.s32.totalorder %s333_s5, %s333_s5 }
   0xd   :  { %402 = vmatprep.subr.bf16.mxu1 %v443_v3  ;;  %p420_p0 = scmp.ne.s32.totalorder %s333_s5, %s419_s27  ;;  %p425_p2 = scmp.lt.s32.totalorder %s419_s27, %s419_s27 }
   0xf   :  { %p426_p3 = por %p425_p2, %p424_p1 }
  0x10   :  { %404 = vmatpush3.bf16.msra.mxu1 %v403_v20 }
  0x11   :  { %p427_p4 = pnand %p426_p3, %p420_p0 }
  0x13   :  { %385 = vmatmul.mubr.msk.f32.vlgmr.msra.gmra.mrb[0].mxu1 %vm114_vm2, %v24_v21 }
  0xdf   :  { %v110_v22 = vpop.f32.mrb[0].mxu0 }
  0xe0   :  { %v367_v26 = vpop.f32.mrb[1].mxu0 }
  0xe6   :  { %v184_v29 = vpop.f32.mrb[0].mxu1 }
  0xe7   :  { %v185_v31 = vadd.f32 %v184_v29, %v110_v22  ;;  %v386_v33 = vpop.f32.mrb[1].mxu1 }
  0xe9   :  { %v195_v34 = vadd.f32 %v342_v30, %v185_v31 }
  0xeb   :  { %v203_v35 = vrot.slane %v195_v34, %v202_v32 }
  0xed   :  { %v204_v37 = vcombine.high %v203_v35, %v203_v35  ;;  %v211_v38 = vrot.slane %v203_v35, %v202_v32 }
  0xef   :  { %v222_v40 = vrot.slane %v211_v38, %v221_v36  ;;  %v218_v41 = vrot.slane %v204_v37, %v202_v32 }
  0xf1   :  { %v229_v43 = vmul.f32 %v222_v40, %v26_v39  ;;  %v226_v44 = vrot.slane %v218_v41, %v221_v36 }
  0xf3   :  { %v231_v45 = vsel %vm40_vm1, %v229_v43, 0.0  ;;  %v230_v46 = vmul.f32 %v226_v44, %v27_v42 }
  0xf4   :  { %232 = vadd.xlane.f32.xlu0 %v231_v45 }
  0xf5   :  { %v234_v47 = vsel %vm40_vm1, %v230_v46, 0.0 }
  0xf8   :  { %235 = vadd.xlane.f32.xlu0 %v234_v47 }
 0x181   :  { %v233_v49 = vpop.xlane.xlu0 %232 }
 0x182   :  { %v244_v52 = vrot.slane %v233_v49, %v243_v50 }
 0x185   :  { %v236_v51 = vpop.xlane.xlu0 %235 }
 0x186   :  { %v248_v53 = vrot.slane %v236_v51, %v243_v50 }
 0x188   :  { %v250_v54 = vsel %vm249_vm3, %v248_v53, %v244_v52 }
 0x189   :  { %v253_v55 = vsel %vm252_vm4, %v250_v54, -inf }
 0x18a   :  { %254 = vmax.xlane.f32.xlu1 %v253_v55 }
 0x217   :  { %v255_v58 = vpop.xlane.xlu1 %254 }
 0x218   :  { %v260_v59 = vrot.slane %v255_v58, %v221_v36  ;;  %v264_v60 = vrot.slane %v255_v58, %v263_v57 }
 0x21a   :  { %v267_v61 = vsub.f32 %v233_v49, %v260_v59  ;;  %v268_v62 = vsub.f32 %v236_v51, %v264_v60 }
 0x21c   :  { %v269_v63 = vmul.f32 1.442695, %v267_v61  ;;  %v271_v0 = vmul.f32 1.442695, %v268_v62 }
 0x21e   :  { %413 = vpow2.f32 %v269_v63 }
 0x21f   :  { %415 = vpow2.f32 %v271_v0 }
 0x228   :  { %v414_v1 = vpop.eup %413 }
 0x229   :  { %v416_v2 = vpop.eup %415  ;;  %276 = vperm.xlu1 %411, %v414_v1  }
 0x22a   :  { %279 = vperm.xlu0 %412, %v416_v2  }
 0x2a8   :  { %v277_v3 = vpop.permute.xlu1 %276 }
 0x2a9   :  { %v280_v4 = vpop.permute.xlu0 %279  ;;  %v284_v5 = vrot.slane %v277_v3, %v243_v50  ;;  %v296_v10 = vmul.f32 %v277_v3, %v26_v39 }
 0x2aa   :  { %v288_v6 = vrot.slane %v280_v4, %v243_v50  ;;  %v297_v9 = vmul.f32 %v280_v4, %v27_v42 }
 0x2ab   :  { %v298_v12 = vsel %vm40_vm1, %v296_v10, 0.0 }
 0x2ac   :  { %v289_v7 = vsel %vm249_vm3, %v288_v6, %v284_v5  ;;  %v305_v11 = vsel %vm40_vm1, %v297_v9, 0.0  ;;  %v299_v14 = vrot.slane %v298_v12, 4 }
 0x2ad   :  { %v291_v8 = vsel %vm252_vm4, %v289_v7, 0.0  ;;  %v306_v13 = vrot.slane %v305_v11, 4 }
 0x2ae   :  { %292 = vadd.xlane.f32.xlu1 %v291_v8  ;;  %v300_v16 = vadd.f32 %v299_v14, %v298_v12 }
 0x2af   :  { %v307_v15 = vadd.f32 %v306_v13, %v305_v11 }
 0x2b0   :  { %v301_v19 = vrot.slane %v300_v16, 2 }
 0x2b1   :  { %v308_v17 = vrot.slane %v307_v15, 2 }
 0x2b2   :  { %v302_v21 = vadd.f32 %v301_v19, %v300_v16 }
 0x2b3   :  { %v309_v20 = vadd.f32 %v308_v17, %v307_v15 }
 0x2b4   :  { %v303_v23 = vrot.slane %v302_v21, 1 }
 0x2b5   :  { %v310_v22 = vrot.slane %v309_v20, 1 }
 0x2b6   :  { %v304_v27 = vadd.f32 %v303_v23, %v302_v21 }
 0x2b7   :  { %v311_v25 = vadd.f32 %v310_v22, %v309_v20 }
 0x33b   :  { %v293_v18 = vpop.xlane.xlu1 %292 }
 0x33c   :  { %417 = vrcp.f32 %v293_v18 }
 0x346   :  { %v418_v24 = vpop.eup %417 }
 0x347   :  { %v314_v26 = vrot.slane %v418_v24, 1  ;;  %v317_v29 = vmul.f32 %v418_v24, %v304_v27 }
 0x349   :  { %v318_v28 = vmul.f32 %v314_v26, %v311_v25 }
 0x34b   :  { %v321_v30 = vrot.slane %v318_v28, 7 }
 0x34d   :  { %v322_v31 = vsel %vm249_vm3, %v321_v30, %v317_v29 }
 0x34e   :  { %325 = vst.msk [vmem:[#allocation2] sm:$0x3] %vm324_vm5, %v322_v31 }
 0x34f   :  { %430 = shalt.err (!%p427_p4)
}
 0x350   :  { %s431_s30 = scalar_lea.hbm %s563_s6, 32 }
 0x351   :  { %p432_p5 = scmp.ne.s32.totalorder %s563_s6, %s431_s30  ;;  %p435_p6 = scmp.lt.u32.totalorder %s431_s30, %s563_s6 }
 0x353   :  { %p437_p7 = pnand %p435_p6, %p432_p5 }
 0x355   :  { %440 = shalt.err (!%p437_p7)
}
 0x356   :  { %335 = dma.vmem_to_hbm [thread:$0]  %s333_s5, 32, %s563_s6, [#allocation3]  }
 0x357   :  { %441 = dma.done.wait [#allocation3], 32  }
 0x358   :  { %442 = vsyncadd [#allocation3], 4294967264 }
 0x359   :  { %339 = vsyncpa [#allocation3], 1 }

</bundles_post_ra>
